<compile_context>
chip_gen: v5e
topology: v5e:2x2
jax: 0.10.0
libtpu: 0.0.40
codegen_flags: <defaults>
</compile_context>

<pallas_src>
import jax
import jax.numpy as jnp
from jax.experimental import pallas as pl
from jax.experimental.pallas import tpu as pltpu

EPS = 1e-07
_FALLBACK_VMEM_CAPACITY = 64 * 1024 * 1024   # smallest per-core VMEM (v7x)


def _round_up(v, m):
    return (v + m - 1) // m * m


def _vmem_capacity_bytes():
    try:
        return int(pltpu.get_tpu_info().vmem_capacity_bytes)
    except Exception:
        return _FALLBACK_VMEM_CAPACITY


def _make_dice_partial_kernel(m, tile, grid_r_per_split, needs_mask):
    def kernel(x_ref, t_ref, inter_ref, card_ref):
        j = pl.program_id(2)

        @pl.when(j == 0)
        def _():
            inter_ref[...] = jnp.zeros_like(inter_ref)
            card_ref[...] = jnp.zeros_like(card_ref)

        xv = x_ref[0].astype(jnp.float32)   # (C, tile)
        tv = t_ref[0].astype(jnp.float32)   # (C, tile)

        if needs_mask:
            # Global tile index (un-clamped) -> element offset of this tile.
            g = pl.program_id(0) * grid_r_per_split + j
            start = g * tile
            lane = jax.lax.broadcasted_iota(jnp.int32, xv.shape, 1)
            valid = (lane + start) < m
            zero = jnp.float32(0.0)
            xv = jnp.where(valid, xv, zero)
            tv = jnp.where(valid, tv, zero)

        # Accumulate directly into the resident output blocks (C, 1) each.
        inter_ref[0, 0] += jnp.sum(xv * tv, axis=1, keepdims=True)
        card_ref[0, 0] += jnp.sum(xv + tv, axis=1, keepdims=True)

    return kernel


def dice_loss_worst(x, target, *, block_byte_budget=None):
    """x, target: (N, C, *spatial) arrays (NCHW for 2-D). Returns scalar loss."""
    n, c = x.shape[0], x.shape[1]

    # Contiguous reshape only — no transpose, no pad, no dtype cast in HBM.
    x3 = x.reshape(n, c, -1)
    t3 = target.reshape(n, c, -1)
    m = x3.shape[2]

    vmem_capacity = _vmem_capacity_bytes()
    if block_byte_budget is None:
        # ~8 MiB per input block on v7x (64 MiB VMEM), ~16 MiB on v5e/v6e.
        block_byte_budget = min(16 * 1024 * 1024, vmem_capacity // 8)
    vmem_limit = int(min(max((vmem_capacity * 3) // 4, 32 * 1024 * 1024),
                         96 * 1024 * 1024))

    # Bytes per lane column including sublane padding (8 rows f32 / 16 bf16 ...).
    col_bytes = max(
        _round_up(c * jnp.dtype(x3.dtype).itemsize, 32),
        _round_up(c * jnp.dtype(t3.dtype).itemsize, 32))
    max_tile = max(128, (block_byte_budget // col_bytes) // 128 * 128)

    if m <= max_tile:
        tile, grid_r = m, 1          # single full-extent block, no masking
    else:
        tile = max_tile              # multiple of 128; last block may be partial
        grid_r = -(-m // tile)

    # Split the reduction tiles across a leading "parallel" axis so both v7x
    # TensorCores get work when the batch axis alone can't balance them.
    n_split = 1
    if (n % 2 == 1) and grid_r >= 2 and (grid_r % 2 == 0 or grid_r >= 8):
        n_split = 2
    grid_r_per_split = -(-grid_r // n_split)

    covered = n_split * grid_r_per_split * tile
    needs_mask = covered != m                          # partial / dummy tiles
    needs_clamp = (n_split * grid_r_per_split) != grid_r  # one dummy tile

    def in_map(s, i, j):
        g = s * grid_r_per_split + j
        if needs_clamp:
            g = jnp.minimum(g, grid_r - 1)   # keep DMA in bounds; mask zeroes it
        return (i, 0, g)

    out_map = lambda s, i, j: (s, i, 0, 0)

    kernel = _make_dice_partial_kernel(m, tile, grid_r_per_split, needs_mask)

    inter_p, card_p = pl.pallas_call(
        kernel,
        out_shape=(
            jax.ShapeDtypeStruct((n_split, n, c, 1), jnp.float32),
            jax.ShapeDtypeStruct((n_split, n, c, 1), jnp.float32),
        ),
        grid_spec=pltpu.PrefetchScalarGridSpec(
            num_scalar_prefetch=0,
            grid=(n_split, n, grid_r_per_split),
            in_specs=[
                pl.BlockSpec((1, c, tile), in_map),
                pl.BlockSpec((1, c, tile), in_map),
            ],
            out_specs=[
                pl.BlockSpec((1, 1, c, 1), out_map),
                pl.BlockSpec((1, 1, c, 1), out_map),
            ],
        ),
        compiler_params=pltpu.CompilerParams(
            dimension_semantics=("parallel", "parallel", "arbitrary"),
            vmem_limit_bytes=vmem_limit,
        ),
    )(x3, t3)

    # Tiny O(n_split * N * C) epilogue: combine partials, dice + min.
    inter = jnp.sum(inter_p, axis=(0, 1))[:, 0]   # (C,)
    card = jnp.sum(card_p, axis=(0, 1))[:, 0]     # (C,)
    dice = 2.0 * inter / (card + EPS)
    return 1.0 - jnp.min(dice)


def _reference(x, target):
    t = target.astype(x.dtype)
    dims = (0,) + tuple(range(2, t.ndim))
    inter = jnp.sum(x * t, axis=dims)
    card = jnp.sum(x + t, axis=dims)
    dice = 2.0 * inter / (card + EPS)
    return 1.0 - jnp.min(dice)


if __name__ == "__main__":
    key = jax.random.PRNGKey(0)
    kx, kt, kx2, kt2 = jax.random.split(key, 4)

    # Case 1: even batch, tile-aligned spatial size (fast path: no mask/split).
    N, C, H, W = 2, 4, 16, 16
    x = jax.nn.softmax(jax.random.normal(kx, (N, C, H, W), dtype=jnp.float32), axis=1)
    labels = jax.random.randint(kt, (N, H, W), 0, C)
    target = jax.nn.one_hot(labels, C, dtype=jnp.float32).transpose(0, 3, 1, 2)

    loss = dice_loss_worst(x, target)
    jax.block_until_ready(loss)
    ref = _reference(x, target)
    assert jnp.allclose(loss, ref, rtol=1e-5, atol=1e-6), (loss, ref)

    # Case 2: odd batch, ragged spatial size, tiny forced tiles — exercises the
    # in-kernel masking, index clamping and the 2-way reduction-axis split.
    N2, C2, H2, W2 = 1, 3, 25, 45
    x2 = jax.nn.softmax(jax.random.normal(kx2, (N2, C2, H2, W2), dtype=jnp.float32), axis=1)
    labels2 = jax.random.randint(kt2, (N2, H2, W2), 0, C2)
    target2 = jax.nn.one_hot(labels2, C2, dtype=jnp.float32).transpose(0, 3, 1, 2)

    loss2 = dice_loss_worst(x2, target2, block_byte_budget=4096)
    jax.block_until_ready(loss2)
    ref2 = _reference(x2, target2)
    assert jnp.allclose(loss2, ref2, rtol=1e-5, atol=1e-6), (loss2, ref2)

    print("KERNEL_OK")
</pallas_src>

<mosaic_0001>
module attributes {stable_mosaic.version = 11 : i64} {
  func.func @kernel(%arg0: i32, %arg1: i32, %arg2: i32, %arg3: memref<1x4x256xf32, #tpu.memory_space<vmem>>, %arg4: memref<1x4x256xf32, #tpu.memory_space<vmem>>, %arg5: memref<1x1x4x1xf32, #tpu.memory_space<vmem>>, %arg6: memref<1x1x4x1xf32, #tpu.memory_space<vmem>>) attributes {dimension_semantics = [#tpu.dimension_semantics<parallel>, #tpu.dimension_semantics<parallel>, #tpu.dimension_semantics<arbitrary>], iteration_bounds = array<i64: 1, 2, 1>, scalar_prefetch = 0 : i64, scratch_operands = 0 : i64, tpu.core_type = #tpu.core_type<tc>, window_params = [{transform_indices = @transform_0, window_bounds = array<i64: 1, 4, 256>}, {transform_indices = @transform_1, window_bounds = array<i64: 1, 4, 256>}, {transform_indices = @transform_2, window_bounds = array<i64: 1, 1, 4, 1>}, {transform_indices = @transform_3, window_bounds = array<i64: 1, 1, 4, 1>}]} {
    %c0_i32 = arith.constant 0 : i32
    %0 = arith.cmpi eq, %arg2, %c0_i32 : i32
    %1 = arith.extui %0 : i1 to i32
    %c0_i32_0 = arith.constant 0 : i32
    %2 = arith.cmpi ne, %1, %c0_i32_0 : i32
    scf.if %2 {
      %cst_23 = arith.constant 0.000000e+00 : f32
      %25 = vector.broadcast %cst_23 : f32 to vector<1x1x4x1xf32>
      %c0_24 = arith.constant 0 : index
      %c0_25 = arith.constant 0 : index
      %c0_26 = arith.constant 0 : index
      %c0_27 = arith.constant 0 : index
      %26 = vector.load %arg5[%c0_24, %c0_25, %c0_26, %c0_27] : memref<1x1x4x1xf32, #tpu.memory_space<vmem>>, vector<1x1x4x1xf32>
      tpu.vector_store %arg5[%c0_24, %c0_25, %c0_26, %c0_27], %25 {strides = array<i32>} : memref<1x1x4x1xf32, #tpu.memory_space<vmem>>, vector<1x1x4x1xf32>,
      %cst_28 = arith.constant 0.000000e+00 : f32
      %27 = vector.broadcast %cst_28 : f32 to vector<1x1x4x1xf32>
      %c0_29 = arith.constant 0 : index
      %c0_30 = arith.constant 0 : index
      %c0_31 = arith.constant 0 : index
      %c0_32 = arith.constant 0 : index
      %28 = vector.load %arg6[%c0_29, %c0_30, %c0_31, %c0_32] : memref<1x1x4x1xf32, #tpu.memory_space<vmem>>, vector<1x1x4x1xf32>
      tpu.vector_store %arg6[%c0_29, %c0_30, %c0_31, %c0_32], %27 {strides = array<i32>} : memref<1x1x4x1xf32, #tpu.memory_space<vmem>>, vector<1x1x4x1xf32>,
    } else {
    }
    %c0 = arith.constant 0 : index
    %c0_1 = arith.constant 0 : index
    %c0_2 = arith.constant 0 : index
    %3 = vector.load %arg3[%c0, %c0_1, %c0_2] : memref<1x4x256xf32, #tpu.memory_space<vmem>>, vector<1x4x256xf32>
    %4 = vector.shape_cast %3 : vector<1x4x256xf32> to vector<4x256xf32>
    %c0_3 = arith.constant 0 : index
    %c0_4 = arith.constant 0 : index
    %c0_5 = arith.constant 0 : index
    %5 = vector.load %arg4[%c0_3, %c0_4, %c0_5] : memref<1x4x256xf32, #tpu.memory_space<vmem>>, vector<1x4x256xf32>
    %6 = vector.shape_cast %5 : vector<1x4x256xf32> to vector<4x256xf32>
    %c0_6 = arith.constant 0 : index
    %c0_7 = arith.constant 0 : index
    %c0_8 = arith.constant 0 : index
    %c0_9 = arith.constant 0 : index
    %7 = vector.load %arg5[%c0_6, %c0_7, %c0_8, %c0_9] : memref<1x1x4x1xf32, #tpu.memory_space<vmem>>, vector<1x1x4x1xf32>
    %8 = vector.shape_cast %7 : vector<1x1x4x1xf32> to vector<4x1xf32>
    %9 = arith.mulf %4, %6 : vector<4x256xf32>
    %cst = arith.constant dense<0.000000e+00> : vector<4xf32>
    %10 = vector.multi_reduction <add>, %9, %cst [1] : vector<4x256xf32> to vector<4xf32>
    %11 = vector.shape_cast %10 : vector<4xf32> to vector<4x1xf32>
    %12 = arith.addf %8, %11 : vector<4x1xf32>
    %c0_10 = arith.constant 0 : index
    %c0_11 = arith.constant 0 : index
    %c0_12 = arith.constant 0 : index
    %c0_13 = arith.constant 0 : index
    %13 = vector.load %arg5[%c0_10, %c0_11, %c0_12, %c0_13] : memref<1x1x4x1xf32, #tpu.memory_space<vmem>>, vector<1x1x4x1xf32>
    %14 = vector.shape_cast %13 : vector<1x1x4x1xf32> to vector<4x1xf32>
    %15 = vector.shape_cast %12 : vector<4x1xf32> to vector<1x1x4x1xf32>
    tpu.vector_store %arg5[%c0_10, %c0_11, %c0_12, %c0_13], %15 {strides = array<i32>} : memref<1x1x4x1xf32, #tpu.memory_space<vmem>>, vector<1x1x4x1xf32>,
    %c0_14 = arith.constant 0 : index
    %c0_15 = arith.constant 0 : index
    %c0_16 = arith.constant 0 : index
    %c0_17 = arith.constant 0 : index
    %16 = vector.load %arg6[%c0_14, %c0_15, %c0_16, %c0_17] : memref<1x1x4x1xf32, #tpu.memory_space<vmem>>, vector<1x1x4x1xf32>
    %17 = vector.shape_cast %16 : vector<1x1x4x1xf32> to vector<4x1xf32>
    %18 = arith.addf %4, %6 : vector<4x256xf32>
    %cst_18 = arith.constant dense<0.000000e+00> : vector<4xf32>
    %19 = vector.multi_reduction <add>, %18, %cst_18 [1] : vector<4x256xf32> to vector<4xf32>
    %20 = vector.shape_cast %19 : vector<4xf32> to vector<4x1xf32>
    %21 = arith.addf %17, %20 : vector<4x1xf32>
    %c0_19 = arith.constant 0 : index
    %c0_20 = arith.constant 0 : index
    %c0_21 = arith.constant 0 : index
    %c0_22 = arith.constant 0 : index
    %22 = vector.load %arg6[%c0_19, %c0_20, %c0_21, %c0_22] : memref<1x1x4x1xf32, #tpu.memory_space<vmem>>, vector<1x1x4x1xf32>
    %23 = vector.shape_cast %22 : vector<1x1x4x1xf32> to vector<4x1xf32>
    %24 = vector.shape_cast %21 : vector<4x1xf32> to vector<1x1x4x1xf32>
    tpu.vector_store %arg6[%c0_19, %c0_20, %c0_21, %c0_22], %24 {strides = array<i32>} : memref<1x1x4x1xf32, #tpu.memory_space<vmem>>, vector<1x1x4x1xf32>,
    return
  }
  func.func @transform_0(%arg0: i32, %arg1: i32, %arg2: i32) -> (i32, i32, i32) {
    %c1_i32 = arith.constant 1 : i32
    %0 = arith.muli %arg0, %c1_i32 : i32
    %1 = arith.addi %0, %arg2 : i32
    %c0_i32 = arith.constant 0 : i32
    %c0_i32_0 = arith.constant 0 : i32
    return %arg1, %c0_i32, %1 : i32, i32, i32
  }
  func.func @transform_1(%arg0: i32, %arg1: i32, %arg2: i32) -> (i32, i32, i32) {
    %c1_i32 = arith.constant 1 : i32
    %0 = arith.muli %arg0, %c1_i32 : i32
    %1 = arith.addi %0, %arg2 : i32
    %c0_i32 = arith.constant 0 : i32
    %c0_i32_0 = arith.constant 0 : i32
    return %arg1, %c0_i32, %1 : i32, i32, i32
  }
  func.func @transform_2(%arg0: i32, %arg1: i32, %arg2: i32) -> (i32, i32, i32, i32) {
    %c0_i32 = arith.constant 0 : i32
    %c0_i32_0 = arith.constant 0 : i32
    %c0_i32_1 = arith.constant 0 : i32
    return %arg0, %arg1, %c0_i32, %c0_i32_0 : i32, i32, i32, i32
  }
  func.func @transform_3(%arg0: i32, %arg1: i32, %arg2: i32) -> (i32, i32, i32, i32) {
    %c0_i32 = arith.constant 0 : i32
    %c0_i32_0 = arith.constant 0 : i32
    %c0_i32_1 = arith.constant 0 : i32
    return %arg0, %arg1, %c0_i32, %c0_i32_0 : i32, i32, i32, i32
  }
}

</mosaic_0001>

<bundles_post_ra>
// kernel: tpu_custom_call.1
= control target key start
LH: loop header
LB: loop body
LE: loop exit
PB: predicated region body
PF: predicated region fallthrough
CT: control target
= control target key end

     0   :  { %9 = vsyncpa [#allocation3], 0  ;;  %s827_s0 = inlined_call_operand.hbm [shape: f32[2,4,256], index: 0, kind: input, shape index: {}]   ;;  %s828_s1 = inlined_call_operand.hbm [shape: f32[2,4,256], index: 1, kind: input, shape index: {}]   ;;  %s829_s2 = inlined_call_operand.vmem [shape: f32[1,2,4,1], index: 2, kind: output, shape index: {0}]   ;;  %s830_s3 = inlined_call_operand.vmem [shape: f32[1,2,4,1], index: 3, kind: output, shape index: {1}]  }
   0x1   :  { %11 = vsyncpa [#allocation3 + $0x1], 0 }
   0x2   :  { %12 = vsyncpa [#allocation5], 0 }
   0x3   :  { %14 = vsyncpa [#allocation5 + $0x1], 0  ;;  %s725_s12 = smov 0   ;;  %s727_s13 = smov 0  }
   0x4   :  { %s729_s14 = smov 0   ;;  %s731_s15 = smov 0  }
   0x5   :  { %s733_s16 = smov 0   ;;  %s735_s17 = smov 0  }
   0x6 LB: > { %s508_s18 = sadd.s32 4294967295, %s702_s17   ;;  %s35_s19 = sadd.s32 1, %s698_s16  ;;  %s702_s17 = sphi %s735_s17, %s20_s17   ;;  %s698_s16 = sphi %s733_s16, %s837_s16   ;;  %s694_s15 = sphi %s731_s15, %s836_s15   ;;  %s690_s14 = sphi %s729_s14, %s835_s14   ;;  %s686_s13 = sphi %s727_s13, %s834_s13   ;;  %s682_s12 = sphi %s725_s12, %s833_s12  }
   0x7   : > { %p37_p0 = scmp.ge.s32.totalorder %s35_s19, 2  ;;  %s50_s20 = sadd.s32 1, %s690_s14 }
   0x8   : > { %p57_p1 = scmp.ne.s32.totalorder %s690_s14, %s686_s13  ;;  %p58_p2 = scmp.eq.s32.totalorder %s702_s17, 0 }
   0x9   : > { %s839_s19 = smov (%p37_p0, %s35_s19), 0  ;;  %p63_p4 = scmp.ne.s32.totalorder %s686_s13, %s682_s12 }
   0xa   : > { %p761_p3 = por %p58_p2, %p57_p1  ;;  %s45_s22 = ssub.s32 %s698_s16, %s839_s19 }
   0xb   : > { %p64_p5 = scmp.eq.s32.totalorder %s508_s18, 0  ;;  %p48_p6 = scmp.eq.s32.totalorder %s45_s22, 0 }
   0xc   : > { %p538_p8 = scmp.lt.s32.totalorder %s702_s17, 2  ;;  %s173_s25 = sand.u32 1, %s690_s14  }
   0xd   : > { %p768_p7 = por %p64_p5, %p63_p4  ;;  %s525_s26 = sshll.u32 %s698_s16, 3 }
   0xe   : > { %s774_s24 = scalar_select %p48_p6, %s690_s14, %s50_s20  }
   0xf   : > { %s512_s27 = sshll.u32 %s173_s25, 3  ;;  %s185_s30 = scalar_lea.hbm %s827_s0, %s525_s26 }
  0x10   : > { %s187_s4 = sshll.u32 %s185_s30, 4  ;;  %s177_s5 = scalar_lea.vmem [#allocation2], %s512_s27  ;;  %s188_s4 = int_to_ptr.hbm [resolvable:$true] %s187_s4 }
  0x11   : > { %s189_s6 = sshll.u32 %s177_s5, 4  ;;  %p532_p9 = pnand %p538_p8, %p761_p3  ;;  %s190_s6 = int_to_ptr.vmem [resolvable:$true] %s189_s6 }
  0x12   : > { %p518_p10 = scmp.ge.s32.totalorder %s702_s17, 1  ;;  %p217_p11 = scmp.lt.s32.totalorder %s702_s17, 3 }
  0x13   : > { %s174_s7 = scalar_lea.sflag [#allocation3], %s173_s25  ;;  %s208_s10 = scalar_lea.hbm %s828_s1, %s525_s26 }
  0x14   : > { %534 = dma.hbm_to_vmem [thread:$0]  (!%p532_p9), %s188_s4, 128, %s190_s6, %s174_s7  }
  0x15   : > { %p218_p12 = pnand %p518_p10, %p217_p11  ;;  %s210_s11 = sshll.u32 %s208_s10, 4  ;;  %s211_s11 = int_to_ptr.hbm [resolvable:$true] %s210_s11 }
  0x16   : > { %s200_s12 = scalar_lea.vmem [#allocation4], %s512_s27  ;;  %s197_s20 = scalar_lea.sflag [#allocation5], %s173_s25 }
  0x17   : > { %s212_s18 = sshll.u32 %s200_s12, 4  ;;  %221 = sbr.rel (%p218_p12) target bundleno = 172 (0xac), region = 28  ;;  %s213_s18 = int_to_ptr.vmem [resolvable:$true] %s212_s18 }
  0x18   : > { %537 = dma.hbm_to_vmem [thread:$0]  (!%p532_p9), %s211_s11, 128, %s213_s18, %s197_s20  }
  0x19   : > { %s223_s21 = sand.u32 (!%p218_p12), 1, %s686_s13  }
  0x1a   : > { %s519_s22 = sshll.u32 (!%p218_p12), %s223_s21, 3  ;;  %s224_s28 = scalar_lea.sflag (!%p218_p12), [#allocation3], %s223_s21 }
  0x1b   : > { %s227_s29 = scalar_lea.vmem (!%p218_p12), [#allocation2], %s519_s22 }
  0x1c   : > { %673 = dma.done.wait (%p768_p7), %s224_s28, 128  }
  0x1d   : > { %675 = vsyncadd (%p768_p7), %s224_s28, 4294967168  ;;  %s234_s26 = scalar_lea.sflag [#allocation5], %s223_s21  ;;  %s237_s27 = scalar_lea.vmem [#allocation4], %s519_s22 }
  0x1e   : > { %677 = dma.done.wait (%p768_p7), %s234_s26, 128  }
  0x1f   : > { %679 = vsyncadd (%p768_p7), %s234_s26, 4294967168  ;;  %p283_p13 = scmp.lt.s32.totalorder %s694_s15, 1  ;;  %vm301_vm0 = vcmask 3072   ;;  %v704_v0 = vmov 0.0   ;;  %v304_v1 = vld [vmem:[%s227_s29] sm:$0xff]  ;;  %v305_v2 = vld [vmem:[%s237_s27] sm:$0xff] }
  0x20   : > { %v307_v3 = vmul.f32 %v305_v2, %v304_v1  ;;  %v324_v4 = vadd.f32 %v305_v2, %v304_v1  ;;  %vm314_vm1 = vcmask 1043456  }
  0x21   : > { %s841_s15 = smov (!%p283_p13, %s694_s15), 1 }
  0x22   : > { %s521_s25 = sshll.u32 %s841_s15, 2  ;;  %309 = vst [vmem:[#allocation1] ss:$2 sm:$0xff] %v307_v3 }
  0x23   : > { %s288_s5 = scalar_lea.vmem %s829_s2, %s521_s25  ;;  %s296_s23 = scalar_lea.vmem %s830_s3, %s521_s25 }
  0x24   : > { %302 = vst.msk [vmem:[%s288_s5] sm:$0xf] %vm301_vm0, %v704_v0 }
  0x25   : > { %303 = vst.msk [vmem:[%s296_s23] sm:$0xf] %vm301_vm0, %v704_v0 }
  0x29   : > { %v310_v5 = vld.sshfl [vmem:[#allocation1] sm:$0xff pattern:$0x75316420]  ;;  %v311_v6 = vld.sshfl [vmem:[#allocation1 + $0x8] sm:$0xff pattern:$0x75316420] }
  0x2a   : > { %v315_v7 = vsel %vm314_vm1, %v310_v5, 0.0  ;;  %v316_v8 = vsel %vm314_vm1, %v311_v6, 0.0  ;;  %326 = vst [vmem:[#allocation1] ss:$2 sm:$0xff] %v324_v4 }
  0x2b   : > { %v317_v9 = vadd.f32 %v316_v8, %v315_v7  ;;  %v306_v15 = vld [vmem:[%s288_s5] sm:$0xf] }
  0x2c   : > { %v323_v18 = vld [vmem:[%s296_s23] sm:$0xf] }
  0x2d   : > { %318 = vadd.xlane.f32.xlu0 %v317_v9 }
  0x31   : > { %v327_v10 = vld.sshfl [vmem:[#allocation1] sm:$0xff pattern:$0x75316420]  ;;  %v328_v11 = vld.sshfl [vmem:[#allocation1 + $0x8] sm:$0xff pattern:$0x75316420] }
  0x32   : > { %v331_v12 = vsel %vm314_vm1, %v327_v10, 0.0  ;;  %v332_v13 = vsel %vm314_vm1, %v328_v11, 0.0 }
  0x33   : > { %v333_v14 = vadd.f32 %v332_v13, %v331_v12 }
  0x35   : > { %334 = vadd.xlane.f32.xlu0 %v333_v14 }
  0xa0   : > { %v319_v16 = vpop.xlane.xlu0 %318 }
  0xa1   : > { %v320_v17 = vadd.f32 %v319_v16, %v306_v15 }
  0xa3   : > { %322 = vst.msk [vmem:[%s288_s5] sm:$0xf] %vm301_vm0, %v320_v17 }
  0xa8   : > { %v335_v19 = vpop.xlane.xlu0 %334 }
  0xa9   : > { %v336_v20 = vadd.f32 %v335_v19, %v323_v18 }
  0xab   : > { %337 = vst.msk [vmem:[%s296_s23] sm:$0xf] %vm301_vm0, %v336_v20 }
  0xac PF: > { %s20_s17 = sadd.s32 1, %s702_s17   ;;  %s833_s12 = smov %s686_s13 }
  0xad   : > { %p17_p0 = scmp.ge.s32.totalorder %s20_s17, 4   ;;  %s834_s13 = smov %s690_s14 }
  0xae   : > { %s835_s14 = smov %s774_s24  ;;  %s836_s15 = smov %s698_s16 }
  0xaf   : > { %s837_s16 = smov %s839_s19  ;;  %19 = sbr.rel (!%p17_p0) target bundleno = 6 (0x6), region = 97 }
  0xb4   :  { %387 = vsyncpa [#allocation3], 1 }
  0xb5   :  { %389 = vsyncpa [#allocation3 + $0x1], 1 }
  0xb6   :  { %390 = vsyncpa [#allocation5], 1 }
  0xb7   :  { %392 = vsyncpa [#allocation5 + $0x1], 1 }

</bundles_post_ra>
